<compile_context>
chip_gen: v5e
topology: v5e:2x2
jax: 0.10.0
libtpu: 0.0.40
codegen_flags: <defaults>
</compile_context>

<pallas_src>
import jax
import jax.numpy as jnp
from jax.experimental import pallas as pl
from jax.experimental.pallas import tpu as pltpu


def _mlp_kernel(x_ref, w1_ref, b1_ref, w2_ref, b2_ref, w3_ref, o_ref):
    """One grid step: a (C_in, TILE_M) column tile of the flattened image.

    layer0: h = relu(W1 @ x + b1)   (BN folded into W1 / b1)
    layer1: h = relu(W2 @ h + b2)   (BN folded into W2 / b2)
    convs : o = W3 @ h              (no bias)
    """
    x = x_ref[...]                                           # (C_in, TM) f32
    h = jnp.maximum(
        jnp.dot(w1_ref[...], x, preferred_element_type=jnp.float32)
        + b1_ref[...], 0.0)                                  # (C_h, TM)
    h = jnp.maximum(
        jnp.dot(w2_ref[...], h, preferred_element_type=jnp.float32)
        + b2_ref[...], 0.0)                                  # (C_h, TM)
    o = jnp.dot(w3_ref[...], h, preferred_element_type=jnp.float32)
    o_ref[...] = o.astype(o_ref.dtype)                       # (C_out, TM)


def mlp_forward(x_nchw, params, *, tile_m=None):
    """Run the MLP on an NCHW input using the Pallas kernel.

    tile_m must be a multiple of 128.  If None it is chosen so the grid has at
    least 2 steps when possible (keeps both v7x TensorCores busy via the
    "parallel" grid axis) while capping the per-step VMEM footprint.
    """
    n, c_in, h, w = x_nchw.shape
    m = n * h * w

    w1, b1, w2, b2, w3 = params
    c_out = w3.shape[0]

    if tile_m is None:
        # Lane-aligned M, then aim for >= 2 grid steps; cap tile at 2048 cols
        # so the streamed activation tiles stay small in VMEM.
        m_lanes = pl.cdiv(m, 128) * 128
        tile_m = min(2048, max(128, (m_lanes // 2 // 128) * 128))
    assert tile_m % 128 == 0, "tile_m must be a multiple of 128 (lane width)"

    # NCHW -> (C_in, N*H*W): channels on sublanes, pixels on the lane axis.
    x_flat = jnp.transpose(x_nchw, (1, 0, 2, 3)).reshape(c_in, m)

    # Pad the pixel axis to a multiple of tile_m (padded columns discarded).
    m_pad = pl.cdiv(m, tile_m) * tile_m
    if m_pad != m:
        x_flat = jnp.pad(x_flat, ((0, 0), (0, m_pad - m)))

    grid = (m_pad // tile_m,)

    col_in = pl.BlockSpec((c_in, tile_m), lambda i: (0, i))
    col_out = pl.BlockSpec((c_out, tile_m), lambda i: (0, i))
    # Full-array blocks with a constant index_map -> weights resident in VMEM.
    full = lambda a: pl.BlockSpec(a.shape, lambda i: (0, 0))

    out_flat = pl.pallas_call(
        _mlp_kernel,
        out_shape=jax.ShapeDtypeStruct((c_out, m_pad), x_nchw.dtype),
        grid_spec=pltpu.PrefetchScalarGridSpec(
            num_scalar_prefetch=0,
            grid=grid,
            in_specs=[
                col_in,            # x tile, lane-dense on M
                full(w1), full(b1),
                full(w2), full(b2),
                full(w3),
            ],
            out_specs=col_out,
        ),
        compiler_params=pltpu.CompilerParams(
            dimension_semantics=("parallel",)),
    )(x_flat, w1, b1, w2, b2, w3)

    out_flat = out_flat[:, :m]
    out = out_flat.reshape(c_out, n, h, w)
    return jnp.transpose(out, (1, 0, 2, 3))  # -> NCHW


def fold_batchnorm(w, b, gamma, beta, mean, var, eps=1e-5):
    """Fold inference-mode BatchNorm into a preceding 1x1 conv.

    y = gamma/sqrt(var+eps) * (W @ x + b - mean) + beta
      = W' @ x + b'   with  W' = s * W (row-wise),  b' = s*(b - mean) + beta.
    """
    s = gamma / jnp.sqrt(var + eps)              # (C_out,)
    w_f = w * s[:, None]                         # (C_out, C_in)
    b_f = s * (b - mean) + beta                  # (C_out,)
    return w_f, b_f[:, None]                     # bias kept as (C_out, 1)


def init_params(key, in_channels, hidden_channels, out_channels,
                dtype=jnp.float32):
    """Parameters matching the PyTorch module's shapes, with BN pre-folded.

    Conv2d(k=1) weight (out, in, 1, 1) is stored as (out, in) so the kernel
    computes W @ x with the pixel axis lane-dense.  BatchNorm uses its init
    values (gamma=1, beta=0, running_mean=0, running_var=1, eps=1e-5).
    """
    k1, k2, k3, k4, k5 = jax.random.split(key, 5)

    def conv_w(k, fan_in, fan_out):
        bound = 1.0 / jnp.sqrt(fan_in)
        return jax.random.uniform(k, (fan_out, fan_in), dtype, -bound, bound)

    def conv_b(k, fan_in, fan_out):
        bound = 1.0 / jnp.sqrt(fan_in)
        return jax.random.uniform(k, (fan_out,), dtype, -bound, bound)

    ones = lambda c: jnp.ones((c,), dtype)
    zeros = lambda c: jnp.zeros((c,), dtype)

    # layer0: conv + BN (folded)
    w1_raw = conv_w(k1, in_channels, hidden_channels)
    b1_raw = conv_b(k2, in_channels, hidden_channels)
    w1, b1 = fold_batchnorm(w1_raw, b1_raw, ones(hidden_channels),
                            zeros(hidden_channels), zeros(hidden_channels),
                            ones(hidden_channels))

    # layer1: conv + BN (folded)
    w2_raw = conv_w(k3, hidden_channels, hidden_channels)
    b2_raw = conv_b(k4, hidden_channels, hidden_channels)
    w2, b2 = fold_batchnorm(w2_raw, b2_raw, ones(hidden_channels),
                            zeros(hidden_channels), zeros(hidden_channels),
                            ones(hidden_channels))

    # final 1x1 conv (no bias)
    w3 = conv_w(k5, hidden_channels, out_channels)

    return (w1, b1, w2, b2, w3)


def _reference(x_nchw, params):
    """Pure-JAX reference of the same forward pass (sanity check)."""
    w1, b1, w2, b2, w3 = params
    n, c, hh, ww = x_nchw.shape
    x = jnp.transpose(x_nchw, (1, 0, 2, 3)).reshape(c, -1).astype(jnp.float32)
    h = jnp.maximum(w1 @ x + b1, 0.0)
    h = jnp.maximum(w2 @ h + b2, 0.0)
    o = w3 @ h
    o = o.reshape(-1, n, hh, ww)
    return jnp.transpose(o, (1, 0, 2, 3)).astype(x_nchw.dtype)


if __name__ == "__main__":
    key = jax.random.PRNGKey(0)
    k_x, k_p = jax.random.split(key)

    # MLP(in_channels=4, hidden_channels=32, out_channels=8, layer_num=2)
    in_channels, hidden_channels, out_channels = 4, 32, 8
    batch, spatial = 2, 16

    x = jax.random.normal(k_x, (batch, in_channels, spatial, spatial),
                          jnp.float32)
    params = init_params(k_p, in_channels, hidden_channels, out_channels)

    # M = 2*16*16 = 512; auto tile_m=256 keeps the grid at 2 steps
    # (both v7x TensorCores busy via the "parallel" grid axis).
    out = mlp_forward(x, params)
    out = jax.block_until_ready(out)

    ref = _reference(x, params)
    assert out.shape == (batch, out_channels, spatial, spatial), out.shape
    assert jnp.allclose(out, ref, atol=1e-5, rtol=1e-5), "mismatch vs reference"

    print("KERNEL_OK")
</pallas_src>

<mosaic_0001>
module attributes {stable_mosaic.version = 11 : i64} {
  func.func @_mlp_kernel(%arg0: i32, %arg1: memref<4x256xf32, #tpu.memory_space<vmem>>, %arg2: memref<32x4xf32, #tpu.memory_space<vmem>>, %arg3: memref<32x1xf32, #tpu.memory_space<vmem>>, %arg4: memref<32x32xf32, #tpu.memory_space<vmem>>, %arg5: memref<32x1xf32, #tpu.memory_space<vmem>>, %arg6: memref<8x32xf32, #tpu.memory_space<vmem>>, %arg7: memref<8x256xf32, #tpu.memory_space<vmem>>) attributes {dimension_semantics = [#tpu.dimension_semantics<parallel>], iteration_bounds = array<i64: 2>, scalar_prefetch = 0 : i64, scratch_operands = 0 : i64, tpu.core_type = #tpu.core_type<tc>, window_params = [{transform_indices = @transform_0, window_bounds = array<i64: 4, 256>}, {pipeline_mode = #tpu.pipeline_mode<synchronous>, transform_indices = @transform_1, window_bounds = array<i64: 32, 4>}, {pipeline_mode = #tpu.pipeline_mode<synchronous>, transform_indices = @transform_2, window_bounds = array<i64: 32, 1>}, {pipeline_mode = #tpu.pipeline_mode<synchronous>, transform_indices = @transform_3, window_bounds = array<i64: 32, 32>}, {pipeline_mode = #tpu.pipeline_mode<synchronous>, transform_indices = @transform_4, window_bounds = array<i64: 32, 1>}, {pipeline_mode = #tpu.pipeline_mode<synchronous>, transform_indices = @transform_5, window_bounds = array<i64: 8, 32>}, {transform_indices = @transform_6, window_bounds = array<i64: 8, 256>}]} {
    %c0 = arith.constant 0 : index
    %c0_0 = arith.constant 0 : index
    %0 = vector.load %arg1[%c0, %c0_0] : memref<4x256xf32, #tpu.memory_space<vmem>>, vector<4x256xf32>
    %c0_1 = arith.constant 0 : index
    %c0_2 = arith.constant 0 : index
    %1 = vector.load %arg2[%c0_1, %c0_2] : memref<32x4xf32, #tpu.memory_space<vmem>>, vector<32x4xf32>
    %cst = arith.constant dense<0.000000e+00> : vector<32x256xf32>
    %2 = tpu.matmul %1, %0, %cst {dimension_numbers = #tpu.dot_dimension_numbers<[1], [0], [0], [1], [0, 0, 1, 1], [], []>} : vector<32x4xf32>, vector<4x256xf32>, vector<32x256xf32> -> vector<32x256xf32>
    %c0_3 = arith.constant 0 : index
    %c0_4 = arith.constant 0 : index
    %3 = vector.load %arg3[%c0_3, %c0_4] : memref<32x1xf32, #tpu.memory_space<vmem>>, vector<32x1xf32>
    %4 = vector.broadcast %3 : vector<32x1xf32> to vector<32x256xf32>
    %5 = arith.addf %2, %4 : vector<32x256xf32>
    %cst_5 = arith.constant 0.000000e+00 : f32
    %6 = vector.broadcast %cst_5 : f32 to vector<32x256xf32>
    %7 = arith.maximumf %5, %6 : vector<32x256xf32>
    %c0_6 = arith.constant 0 : index
    %c0_7 = arith.constant 0 : index
    %8 = vector.load %arg4[%c0_6, %c0_7] : memref<32x32xf32, #tpu.memory_space<vmem>>, vector<32x32xf32>
    %cst_8 = arith.constant dense<0.000000e+00> : vector<32x256xf32>
    %9 = tpu.matmul %8, %7, %cst_8 {dimension_numbers = #tpu.dot_dimension_numbers<[1], [0], [0], [1], [0, 0, 1, 1], [], []>} : vector<32x32xf32>, vector<32x256xf32>, vector<32x256xf32> -> vector<32x256xf32>
    %c0_9 = arith.constant 0 : index
    %c0_10 = arith.constant 0 : index
    %10 = vector.load %arg5[%c0_9, %c0_10] : memref<32x1xf32, #tpu.memory_space<vmem>>, vector<32x1xf32>
    %11 = vector.broadcast %10 : vector<32x1xf32> to vector<32x256xf32>
    %12 = arith.addf %9, %11 : vector<32x256xf32>
    %cst_11 = arith.constant 0.000000e+00 : f32
    %13 = vector.broadcast %cst_11 : f32 to vector<32x256xf32>
    %14 = arith.maximumf %12, %13 : vector<32x256xf32>
    %c0_12 = arith.constant 0 : index
    %c0_13 = arith.constant 0 : index
    %15 = vector.load %arg6[%c0_12, %c0_13] : memref<8x32xf32, #tpu.memory_space<vmem>>, vector<8x32xf32>
    %cst_14 = arith.constant dense<0.000000e+00> : vector<8x256xf32>
    %16 = tpu.matmul %15, %14, %cst_14 {dimension_numbers = #tpu.dot_dimension_numbers<[1], [0], [0], [1], [0, 0, 1, 1], [], []>} : vector<8x32xf32>, vector<32x256xf32>, vector<8x256xf32> -> vector<8x256xf32>
    %c0_15 = arith.constant 0 : index
    %c0_16 = arith.constant 0 : index
    %17 = vector.load %arg7[%c0_15, %c0_16] : memref<8x256xf32, #tpu.memory_space<vmem>>, vector<8x256xf32>
    tpu.vector_store %arg7[%c0_15, %c0_16], %16 {strides = array<i32>} : memref<8x256xf32, #tpu.memory_space<vmem>>, vector<8x256xf32>,
    return
  }
  func.func @transform_0(%arg0: i32) -> (i32, i32) {
    %c0_i32 = arith.constant 0 : i32
    %c0_i32_0 = arith.constant 0 : i32
    return %c0_i32, %arg0 : i32, i32
  }
  func.func @transform_1(%arg0: i32) -> (i32, i32) {
    %c0_i32 = arith.constant 0 : i32
    %c0_i32_0 = arith.constant 0 : i32
    %c0_i32_1 = arith.constant 0 : i32
    return %c0_i32, %c0_i32_0 : i32, i32
  }
  func.func @transform_2(%arg0: i32) -> (i32, i32) {
    %c0_i32 = arith.constant 0 : i32
    %c0_i32_0 = arith.constant 0 : i32
    %c0_i32_1 = arith.constant 0 : i32
    return %c0_i32, %c0_i32_0 : i32, i32
  }
  func.func @transform_3(%arg0: i32) -> (i32, i32) {
    %c0_i32 = arith.constant 0 : i32
    %c0_i32_0 = arith.constant 0 : i32
    %c0_i32_1 = arith.constant 0 : i32
    return %c0_i32, %c0_i32_0 : i32, i32
  }
  func.func @transform_4(%arg0: i32) -> (i32, i32) {
    %c0_i32 = arith.constant 0 : i32
    %c0_i32_0 = arith.constant 0 : i32
    %c0_i32_1 = arith.constant 0 : i32
    return %c0_i32, %c0_i32_0 : i32, i32
  }
  func.func @transform_5(%arg0: i32) -> (i32, i32) {
    %c0_i32 = arith.constant 0 : i32
    %c0_i32_0 = arith.constant 0 : i32
    %c0_i32_1 = arith.constant 0 : i32
    return %c0_i32, %c0_i32_0 : i32, i32
  }
  func.func @transform_6(%arg0: i32) -> (i32, i32) {
    %c0_i32 = arith.constant 0 : i32
    %c0_i32_0 = arith.constant 0 : i32
    return %c0_i32, %arg0 : i32, i32
  }
}

</mosaic_0001>

<bundles_post_ra>
// kernel: tpu_custom_call.1
= control target key start
LH: loop header
LB: loop body
LE: loop exit
PB: predicated region body
PF: predicated region fallthrough
CT: control target
= control target key end

     0   :  { %11 = vsyncpa [#allocation3], 0  ;;  %s928_s0 = inlined_call_operand.vmem [shape: f32[4,512], index: 0, kind: input, shape index: {}]   ;;  %s929_s1 = inlined_call_operand.vmem [shape: f32[32,4], index: 1, kind: input, shape index: {}]   ;;  %s930_s2 = inlined_call_operand.vmem [shape: f32[32,1], index: 2, kind: input, shape index: {}]   ;;  %s931_s3 = inlined_call_operand.vmem [shape: f32[32,32], index: 3, kind: input, shape index: {}]   ;;  %s932_s4 = inlined_call_operand.vmem [shape: f32[32,1], index: 4, kind: input, shape index: {}]   ;;  %s933_s5 = inlined_call_operand.vmem [shape: f32[8,32], index: 5, kind: input, shape index: {}]   ;;  %s934_s6 = inlined_call_operand.hbm [shape: f32[8,512], index: 6, kind: output, shape index: {}]  }
   0x1   :  { %13 = vsyncpa [#allocation3 + $0x1], 0  ;;  %s775_s21 = smov 0   ;;  %s777_s22 = smov 0  }
   0x2   :  { %s779_s23 = smov 0   ;;  %s781_s24 = smov 0  }
   0x3 LB: > { %s796_s25 = sadd.s32 4294967295, %s737_s24   ;;  %s599_s26 = sadd.s32 4294967294, %s737_s24   ;;  %s737_s24 = sphi %s781_s24, %s940_s24   ;;  %s733_s23 = sphi %s779_s23, %s939_s23   ;;  %s729_s22 = sphi %s777_s22, %s938_s22   ;;  %s725_s21 = sphi %s775_s21, %s937_s21  }
   0x4   : > { %s800_s27 = sadd.s32 1, %s737_s24   ;;  %s157_s28 = sadd.s32 1, %s733_s23 }
   0x5   : > { %s154_s29 = ssub.s32 %s737_s24, %s800_s27  ;;  %p167_p0 = scmp.ne.s32.totalorder %s733_s23, %s729_s22 }
   0x6   : > { %p155_p1 = scmp.eq.s32.totalorder %s154_s29, 0  ;;  %p168_p2 = scmp.eq.s32.totalorder %s796_s25, 1 }
   0x7   : > { %p173_p3 = scmp.ne.s32.totalorder %s729_s22, %s725_s21  ;;  %p174_p4 = scmp.eq.s32.totalorder %s599_s26, 1 }
   0x8   : > { %s811_s30 = scalar_select %p155_p1, %s733_s23, %s157_s28  }
   0x9   : > { %p813_p5 = por %p168_p2, %p167_p0  ;;  %p817_p6 = por %p174_p4, %p173_p3 }
   0xa   : > { %p602_p7 = scmp.ge.s32.totalorder %s737_s24, 1  ;;  %p216_p8 = scmp.lt.s32.totalorder %s737_s24, 3 }
   0xc   : > { %p217_p9 = pnand %p602_p7, %p216_p8 }
   0xd   : > { %s604_s9 = sshll.u32 (!%p217_p9), %s796_s25, 1  ;;  %s243_s18 = sand.u32 (!%p217_p9), 1, %s729_s22  }
   0xe   : > { %220 = sbr.rel (%p217_p9) target bundleno = 490 (0x1ea), region = 44  ;;  %p247_p10 = scmp.lt.s32.totalorder (!%p217_p9), %s604_s9, 3 }
   0xf   : > { %s603_s19 = sshll.u32 (!%p217_p9), %s243_s18, 4  ;;  %s631_s20 = sshll.u32 (!%p217_p9), %s796_s25, 4 }
  0x10   : > { %s535_s29 = scalar_lea.hbm (!%p217_p9), %s934_s6, %s631_s20  ;;  %s524_s12 = scalar_lea.sflag (!%p217_p9), [#allocation3], %s243_s18 }
  0x11   : > { %s539_s11 = sshll.u32 (!%p217_p9), %s535_s29, 4  ;;  %s695_s16 = scalar_lea.hbm (!%p217_p9), %s934_s6, 32  ;;  %s540_s11 = int_to_ptr.hbm [resolvable:$true] %s539_s11 }
  0x12   : > { %s689_s13 = sshra.s32 (!%p217_p9), %s540_s11, 4  ;;  %s690_s13 = int_to_ptr.hbm [resolvable:$true] %s689_s13 }
  0x13   : > { %v259_v0 = vld [vmem:[%s930_s2 + $0x8] sm:$0xff]  ;;  %v739_v1 = vmov 0   ;;  %v261_v2 = vld [vmem:[%s930_s2 + $0x18] sm:$0xff]  ;;  %s942_s9 = smov (!%p247_p10, %s604_s9), 3  ;;  %v258_v4 = vld [vmem:[%s930_s2] sm:$0xff]  ;;  %vm299_vm0 = vcmask 1043456   ;;  %p696_p0 = scmp.lt.s32.totalorder %s690_s13, %s934_s6 }
  0x14   : > { %673 = vset.pattern.permute.xlu1 %v739_v1  ;;  %672 = vset.pattern.permute.xlu0 %v739_v1  ;;  %s605_s14 = sshll.u32 %s942_s9, 2  ;;  %v260_v5 = vld [vmem:[%s930_s2 + $0x10] sm:$0xff]  ;;  %v254_v6 = vld [vmem:[%s929_s1] sm:$0xff]  ;;  %vm286_vm1 = vcmask 31744   ;;  %v375_v7 = vld [vmem:[%s932_s4 + $0x8] sm:$0xff]  ;;  %vm398_vm2 = vcmask 261120  }
  0x15   : > { %269 = vperm.xlu1 %673, %v259_v0   ;;  %279 = vperm.xlu0 %672, %v261_v2   ;;  %s250_s17 = scalar_lea.vmem %s928_s0, %s605_s14  ;;  %v374_v8 = vld [vmem:[%s932_s4] sm:$0xff]  ;;  %v255_v11 = vld [vmem:[%s929_s1 + $0x8] sm:$0xff]  ;;  %v256_v12 = vld [vmem:[%s929_s1 + $0x10] sm:$0xff]  ;;  %s245_s9 = scalar_lea.vmem [#allocation2], %s603_s19 }
  0x16   : > { %674 = vset.pattern.permute.xlu2 %v739_v1  ;;  %v253_v3 = vld [vmem:[%s250_s17] sm:$0xff]  ;;  %v257_v13 = vld [vmem:[%s929_s1 + $0x18] sm:$0xff]  ;;  %v376_v44 = vld [vmem:[%s932_s4 + $0x10] sm:$0xff]  ;;  %s537_s10 = sshll.u32 %s245_s9, 4  ;;  %s691_s14 = scalar_lea.hbm %s690_s13, 16  ;;  %s538_s10 = int_to_ptr.vmem [resolvable:$true] %s537_s10 }
  0x17   : > { %283 = vst [vmem:[#allocation1] ss:$2 sm:$0xff] %v253_v3  ;;  %v377_v34 = vld [vmem:[%s932_s4 + $0x18] sm:$0xff]  ;;  %v370_v43 = vld [vmem:[%s931_s3] sm:$0xff]  ;;  %v371_v45 = vld [vmem:[%s931_s3 + $0x8] sm:$0xff]  ;;  %p692_p11 = scmp.ne.s32.totalorder %s690_s13, %s691_s14  ;;  %p697_p1 = scmp.lt.s32.totalorder %s695_s16, %s691_s14 }
  0x18   : > { %395 = vperm.xlu2 %674, %v377_v34   ;;  %v372_v46 = vld [vmem:[%s931_s3 + $0x10] sm:$0xff]  ;;  %v373_v47 = vld [vmem:[%s931_s3 + $0x18] sm:$0xff] }
  0x19   : > { %p693_p12 = pnand %p692_p11, %p813_p5  ;;  %p698_p2 = por %p697_p1, %p696_p0 }
  0x1b   : > { %p694_p13 = pneg %p693_p12 }
  0x1d   : > { %264 = vperm.xlu1 %673, %v258_v4   ;;  %274 = vperm.xlu0 %672, %v260_v5   ;;  %p699_p3 = pnand %p698_p2, %p694_p13 }
  0x1e   : > { %v284_v9 = vld.sshfl [vmem:[#allocation1] sm:$0xff pattern:$0x75316420]  ;;  %v285_v10 = vld.sshfl [vmem:[#allocation1 + $0x8] sm:$0xff pattern:$0x75316420] }
  0x1f   : > { %606 = vmatpush.msk.msra.mxu0 %vm299_vm0, %v284_v9  ;;  %611 = vmatpush.msk.msra.mxu1 %vm299_vm0, %v285_v10 }
  0x20   : > { %607 = vmatmul.msk.f32.vlgmr.msra.gmra.mxu0 %vm286_vm1, %v254_v6  ;;  %612 = vmatmul.msk.f32.vlgmr.msra.gmra.mxu1 %vm286_vm1, %v254_v6 }
  0x21   : > { %390 = vperm.xlu2 %674, %v376_v44  }
  0x25   : > { %385 = vperm.xlu0 %672, %v375_v7   ;;  %380 = vperm.xlu1 %673, %v374_v8  }
  0x28   : > { %608 = vmatmul.msk.f32.gmra.mxu0 %vm286_vm1, %v255_v11  ;;  %613 = vmatmul.msk.f32.gmra.mxu1 %vm286_vm1, %v255_v11 }
  0x30   : > { %609 = vmatmul.msk.f32.gmra.mxu0 %vm286_vm1, %v256_v12  ;;  %614 = vmatmul.msk.f32.gmra.mxu1 %vm286_vm1, %v256_v12  ;;  %v477_v12 = vld [vmem:[%s933_s5] sm:$0xff] }
  0x38   : > { %610 = vmatmul.msk.f32.gmra.mxu0 %vm286_vm1, %v257_v13  ;;  %615 = vmatmul.msk.f32.gmra.mxu1 %vm286_vm1, %v257_v13 }
  0x72   : > { %v396_v52 = vpop.permute.xlu2 %395 }
  0x7b   : > { %v391_v55 = vpop.permute.xlu2 %390 }
  0x87   : > { %v280_v18 = vpop.permute.xlu0 %279  ;;  %v270_v19 = vpop.permute.xlu1 %269 }
  0x8f   : > { %v275_v22 = vpop.permute.xlu0 %274  ;;  %v265_v29 = vpop.permute.xlu1 %264 }
  0x97   : > { %v386_v62 = vpop.permute.xlu0 %385  ;;  %v381_v3 = vpop.permute.xlu1 %380 }
  0x9d   : > { %v321_v14 = vpop.f32.mrf.mxu0  ;;  %v350_v15 = vpop.f32.mrf.mxu1 }
  0x9e   : > { %v322_v35 = vadd.f32 %v321_v14, %v265_v29  ;;  %v351_v36 = vadd.f32 %v350_v15, %v265_v29 }
  0xa0   : > { %v362_v41 = vmax.f32 %v322_v35, 0.0  ;;  %v363_v42 = vmax.f32 %v351_v36, 0.0 }
  0xa5   : > { %v324_v16 = vpop.f32.mrf.mxu0  ;;  %v353_v17 = vpop.f32.mrf.mxu1 }
  0xa6   : > { %v325_v30 = vadd.f32 %v324_v16, %v270_v19  ;;  %v354_v31 = vadd.f32 %v353_v17, %v270_v19 }
  0xa8   : > { %v364_v39 = vmax.f32 %v325_v30, 0.0  ;;  %v365_v40 = vmax.f32 %v354_v31, 0.0 }
  0xad   : > { %v327_v20 = vpop.f32.mrf.mxu0  ;;  %v356_v21 = vpop.f32.mrf.mxu1 }
  0xae   : > { %v328_v25 = vadd.f32 %v327_v20, %v275_v22  ;;  %v357_v26 = vadd.f32 %v356_v21, %v275_v22 }
  0xb0   : > { %v366_v37 = vmax.f32 %v328_v25, 0.0  ;;  %v367_v38 = vmax.f32 %v357_v26, 0.0 }
  0xb5   : > { %v330_v23 = vpop.f32.mrf.mxu0  ;;  %v359_v24 = vpop.f32.mrf.mxu1 }
  0xb6   : > { %v331_v27 = vadd.f32 %v330_v23, %v280_v18  ;;  %v360_v28 = vadd.f32 %v359_v24, %v280_v18 }
  0xb8   : > { %v368_v32 = vmax.f32 %v331_v27, 0.0  ;;  %v369_v33 = vmax.f32 %v360_v28, 0.0 }
  0xba   : > { %423 = vmatpush.msra.mxu2 %v368_v32  ;;  %452 = vmatpush.msra.mxu3 %v369_v33 }
  0xbc   : > { %424 = vmatpush.msra.mxu2 %v366_v37  ;;  %453 = vmatpush.msra.mxu3 %v367_v38 }
  0xbe   : > { %425 = vmatpush.msra.mxu2 %v364_v39  ;;  %454 = vmatpush.msra.mxu3 %v365_v40 }
  0xc0   : > { %426 = vmatpush.msra.mxu2 %v362_v41  ;;  %455 = vmatpush.msra.mxu3 %v363_v42 }
  0xc1   : > { %616 = vmatmul.msk.f32.vlgmr.msra.gmra.mxu2 %vm398_vm2, %v370_v43  ;;  %620 = vmatmul.msk.f32.vlgmr.msra.gmra.mxu3 %vm398_vm2, %v370_v43 }
  0xc9   : > { %617 = vmatmul.msk.f32.gmra.mxu2 %vm398_vm2, %v371_v45  ;;  %621 = vmatmul.msk.f32.gmra.mxu3 %vm398_vm2, %v371_v45 }
  0xd1   : > { %618 = vmatmul.msk.f32.gmra.mxu2 %vm398_vm2, %v372_v46  ;;  %622 = vmatmul.msk.f32.gmra.mxu3 %vm398_vm2, %v372_v46 }
  0xd9   : > { %619 = vmatmul.msk.f32.gmra.mxu2 %vm398_vm2, %v373_v47  ;;  %623 = vmatmul.msk.f32.gmra.mxu3 %vm398_vm2, %v373_v47 }
 0x144   : > { %v428_v48 = vpop.f32.mrf.mxu2  ;;  %v457_v49 = vpop.f32.mrf.mxu3 }
 0x145   : > { %v429_v4 = vadd.f32 %v428_v48, %v381_v3  ;;  %v458_v5 = vadd.f32 %v457_v49, %v381_v3 }
 0x147   : > { %v469_v10 = vmax.f32 %v429_v4, 0.0  ;;  %v470_v11 = vmax.f32 %v458_v5, 0.0 }
 0x14c   : > { %v431_v50 = vpop.f32.mrf.mxu2  ;;  %v460_v51 = vpop.f32.mrf.mxu3 }
 0x14d   : > { %v432_v63 = vadd.f32 %v431_v50, %v386_v62  ;;  %v461_v0 = vadd.f32 %v460_v51, %v386_v62 }
 0x14f   : > { %v471_v8 = vmax.f32 %v432_v63, 0.0  ;;  %v472_v9 = vmax.f32 %v461_v0, 0.0 }
 0x154   : > { %v434_v53 = vpop.f32.mrf.mxu2  ;;  %v463_v54 = vpop.f32.mrf.mxu3 }
 0x155   : > { %v435_v58 = vadd.f32 %v434_v53, %v391_v55  ;;  %v464_v59 = vadd.f32 %v463_v54, %v391_v55 }
 0x157   : > { %v473_v6 = vmax.f32 %v435_v58, 0.0  ;;  %v474_v7 = vmax.f32 %v464_v59, 0.0 }
 0x15c   : > { %v437_v56 = vpop.f32.mrf.mxu2  ;;  %v466_v57 = vpop.f32.mrf.mxu3 }
 0x15d   : > { %v438_v60 = vadd.f32 %v437_v56, %v396_v52  ;;  %v467_v61 = vadd.f32 %v466_v57, %v396_v52 }
 0x15f   : > { %v475_v1 = vmax.f32 %v438_v60, 0.0  ;;  %v476_v2 = vmax.f32 %v467_v61, 0.0 }
 0x161   : > { %493 = vmatpush.msrb.mxu0 %v475_v1  ;;  %513 = vmatpush.msrb.mxu1 %v476_v2 }
 0x163   : > { %494 = vmatpush.msrb.mxu0 %v473_v6  ;;  %514 = vmatpush.msrb.mxu1 %v474_v7 }
 0x165   : > { %495 = vmatpush.msrb.mxu0 %v471_v8  ;;  %515 = vmatpush.msrb.mxu1 %v472_v9 }
 0x167   : > { %496 = vmatpush.msrb.mxu0 %v469_v10  ;;  %516 = vmatpush.msrb.mxu1 %v470_v11 }
 0x168   : > { %624 = vmatmul.msk.f32.vlgmr.msrb.gmra.mxu0 %vm398_vm2, %v477_v12  ;;  %625 = vmatmul.msk.f32.vlgmr.msrb.gmra.mxu1 %vm398_vm2, %v477_v12 }
 0x1e5   : > { %v498_v13 = vpop.f32.mrf.mxu0  ;;  %v518_v14 = vpop.f32.mrf.mxu1 }
 0x1e6   : > { %521 = vst [vmem:[%s245_s9] sm:$0xff] %v498_v13 }
 0x1e7   : > { %522 = vst [vmem:[%s245_s9 + $0x8] sm:$0xff] %v518_v14 }
 0x1e8   : > { %702 = shalt.err (!%p699_p3)
}
 0x1e9   : > { %632 = dma.vmem_to_hbm [thread:$0]  (%p813_p5), %s538_s10, 256, %s540_s11, %s524_s12  }
 0x1ea PF: > { %p638_p4 = scmp.ge.s32.totalorder %s737_s24, 2  ;;  %s551_s18 = sand.u32 1, %s725_s21  }
 0x1eb   : > { %s552_s20 = scalar_lea.sflag [#allocation3], %s551_s18 }
 0x1ec   : > { %p635_p7 = pnand %p638_p4, %p817_p6 }
 0x1ee   : > { %p636_p8 = pneg %p635_p7 }
 0x1f0   : > { %720 = dma.done.wait (%p636_p8), %s552_s20, 256  }
 0x1f1   : > { %722 = vsyncadd (%p636_p8), %s552_s20, 4294967040  ;;  %p16_p9 = scmp.ge.s32.totalorder %s800_s27, 4   ;;  %s937_s21 = smov %s729_s22 }
 0x1f2   : > { %s938_s22 = smov %s733_s23  ;;  %s939_s23 = smov %s811_s30 }
 0x1f3   : > { %s940_s24 = smov %s800_s27  ;;  %18 = sbr.rel (!%p16_p9) target bundleno = 3 (0x3), region = 79 }
 0x1f8   :  { %558 = vsyncpa [#allocation3], 1 }
 0x1f9   :  { %560 = vsyncpa [#allocation3 + $0x1], 1 }

</bundles_post_ra>
